<compile_context>
chip_gen: v5e
topology: v5e:2x2
jax: 0.10.0
libtpu: 0.0.40
codegen_flags: <defaults>
</compile_context>

<pallas_src>
import math
import jax
import jax.numpy as jnp
from jax.experimental import pallas as pl
from jax.experimental.pallas import tpu as pltpu


def _round_up(x, m):
    return (x + m - 1) // m * m


# ----------------------------------------------------------------------------
# Per-generation tiling profiles
# ----------------------------------------------------------------------------
def _tpu_profile():
    try:
        kind = jax.devices()[0].device_kind.lower()
    except Exception:
        kind = ""
    if "v7" in kind:
        gen = "v7x"
    elif "v6" in kind:
        gen = "v6e"
    elif "v5" in kind and ("lite" in kind or "v5e" in kind):
        gen = "v5e"
    else:
        gen = "default"
    profiles = {
        #          rows/tile   MXU align  footprint budget   scoped VMEM limit  d_ff chunk cap
        "v5e":     dict(tm=256,  align=128, budget=80 << 20,  vmem=100 << 20, tf_cap=1024),
        "v6e":     dict(tm=1024, align=256, budget=92 << 20,  vmem=104 << 20, tf_cap=2048),
        "v7x":     dict(tm=512,  align=256, budget=44 << 20,  vmem=56 << 20,  tf_cap=1024),
        "default": dict(tm=512,  align=128, budget=40 << 20,  vmem=56 << 20,  tf_cap=1024),
    }
    return gen, profiles[gen]


def _auto_tm(M, gen, tm_target, m_align):
    if M <= 8:
        return 8
    if M < m_align:
        return _round_up(M, 8)          # single small tile, minimal padding
    tm = min(tm_target, _round_up(M, m_align))
    if gen == "v7x":
        # Prefer >=2 M-tiles so the "parallel" axis splits across both TensorCores.
        while tm > 128 and M <= tm:
            tm //= 2
    return tm


def _select_config(M, d_model, d_ff, x_it, w_it, out_it, tm, tf):
    gen, prof = _tpu_profile()
    budget, tf_cap = prof["budget"], prof["tf_cap"]

    def footprint(TM, TF):
        b = 2 * TM * d_model * (x_it + out_it)      # x/out tiles (double-buffered)
        b += 2 * TF * d_model * w_it * 2            # w1 + w2 chunks (double-buffered)
        b += 2 * (TF + d_model) * w_it              # biases
        b += TM * d_model * 4                       # f32 accumulator / result
        b += TM * TF * (4 + w_it)                   # fc1 activation temp (f32 + cast)
        return b

    if tm is not None:
        TM = max(8, _round_up(min(tm, M), 8))
    else:
        TM = _auto_tm(M, gen, prof["tm"], prof["align"])

    while True:
        # Weight-resident fast path: full d_ff in one block, no reduction axis.
        # Constant weight index_maps -> weights are DMA'd once and stay in VMEM
        # across every M tile; only x/out stream from HBM.
        if tf is None and footprint(TM, d_ff) <= budget:
            return TM, d_ff, d_ff, True, prof

        if tf is not None:                          # explicit override (tests/tuning)
            TF = min(tf, d_ff)
            return TM, TF, _round_up(d_ff, TF), False, prof

        # Chunked reduction over d_ff: prefer chunk sizes that divide d_ff (avoids
        # per-call weight padding), largest that fits the footprint budget.
        sizes = (2048, 1024, 512, 256, 128)
        cands = [t for t in sizes if t <= min(d_ff, tf_cap) and d_ff % t == 0]
        cands += [t for t in sizes if t <= min(d_ff, tf_cap) and d_ff % t != 0]
        TF = next((t for t in cands if footprint(TM, t) <= budget), None)
        if TF is not None:
            return TM, TF, _round_up(d_ff, TF), False, prof
        if TM > 128:                                # shrink rows and retry
            TM = max(128, TM // 2)
            continue
        TF = 128 if d_ff >= 128 else d_ff           # best effort
        return TM, TF, _round_up(d_ff, TF), False, prof


# ----------------------------------------------------------------------------
# Kernels
# ----------------------------------------------------------------------------
def _ffn_kernel_resident(x_ref, w1_ref, b1_ref, w2_ref, b2_ref, o_ref):
    # Full d_ff per step: h = relu(x @ w1 + b1); o = h @ w2 + b2.
    h = jnp.dot(x_ref[...], w1_ref[...], preferred_element_type=jnp.float32)
    h = jnp.maximum(h + b1_ref[...].astype(jnp.float32), 0.0)
    # TODO(synk): dropout is identity (eval mode); training-mode dropout
    # (pltpu.prng_seed + pltpu.stateful_bernoulli) intentionally not applied here.
    y = jnp.dot(h.astype(w2_ref.dtype), w2_ref[...], preferred_element_type=jnp.float32)
    o_ref[...] = (y + b2_ref[...].astype(jnp.float32)).astype(o_ref.dtype)


def _ffn_kernel_reduce(x_ref, w1_ref, b1_ref, w2_ref, b2_ref, o_ref, acc_ref):
    k = pl.program_id(1)

    @pl.when(k == 0)
    def _init():
        # Fold the fc2 bias into the accumulator init (one broadcast per M-tile).
        acc_ref[...] = jnp.broadcast_to(
            b2_ref[...].astype(jnp.float32), acc_ref.shape)

    # fc1 chunk: (TM, d_model) @ (d_model, TF), f32 accumulation on the MXU.
    h = jnp.dot(x_ref[...], w1_ref[...], preferred_element_type=jnp.float32)
    h = jnp.maximum(h + b1_ref[...].astype(jnp.float32), 0.0)
    # TODO(synk): dropout is identity (eval mode).

    # fc2 chunk: (TM, TF) @ (TF, d_model); accumulate over the d_ff grid axis.
    acc_ref[...] += jnp.dot(h.astype(w2_ref.dtype), w2_ref[...],
                            preferred_element_type=jnp.float32)

    @pl.when(k == pl.num_programs(1) - 1)
    def _finalize():
        o_ref[...] = acc_ref[...].astype(o_ref.dtype)


# ----------------------------------------------------------------------------
# Wrapper
# ----------------------------------------------------------------------------
def feed_forward(x, w1, b1, w2, b2, *, tm=None, tf=None):
    """x: (batch, seq, d_model) -> (batch, seq, d_model).

    For peak MXU throughput pass x/w1/w2 as bf16 (accumulation is f32 either way).
    """
    batch, seq, d_model = x.shape
    d_ff = w1.shape[1]
    M = batch * seq
    x_it = jnp.dtype(x.dtype).itemsize
    w_it = jnp.dtype(w1.dtype).itemsize

    TM, TF, Fp, resident, prof = _select_config(
        M, d_model, d_ff, x_it, w_it, x_it, tm, tf)

    Mp = _round_up(M, TM)
    x2d = x.reshape(M, d_model)
    if Mp != M:
        x2d = jnp.pad(x2d, ((0, Mp - M), (0, 0)))
    if Fp != d_ff:
        # Rare fallback (TF is chosen to divide d_ff whenever possible).
        # Zero-padded d_ff columns contribute exactly 0 through ReLU + 2nd matmul.
        w1 = jnp.pad(w1, ((0, 0), (0, Fp - d_ff)))
        b1 = jnp.pad(b1, (0, Fp - d_ff))
        w2 = jnp.pad(w2, ((0, Fp - d_ff), (0, 0)))
    b1_2d = b1.reshape(1, Fp)
    b2_2d = b2.reshape(1, d_model)

    m_tiles = Mp // TM
    cost = pl.CostEstimate(
        flops=4 * M * d_model * d_ff,
        transcendentals=0,
        bytes_accessed=(2 * M * d_model * x_it
                        + 2 * d_model * d_ff * w_it * (1 if resident else m_tiles)))

    if resident:
        compiler_params = pltpu.CompilerParams(
            dimension_semantics=("parallel",),
            vmem_limit_bytes=prof["vmem"])
        out = pl.pallas_call(
            _ffn_kernel_resident,
            out_shape=jax.ShapeDtypeStruct((Mp, d_model), x.dtype),
            grid_spec=pltpu.PrefetchScalarGridSpec(
                num_scalar_prefetch=0,
                grid=(m_tiles,),
                in_specs=[
                    pl.BlockSpec((TM, d_model), lambda i: (i, 0)),   # x tile
                    pl.BlockSpec((d_model, Fp), lambda i: (0, 0)),   # w1 (resident)
                    pl.BlockSpec((1, Fp), lambda i: (0, 0)),         # b1 (resident)
                    pl.BlockSpec((Fp, d_model), lambda i: (0, 0)),   # w2 (resident)
                    pl.BlockSpec((1, d_model), lambda i: (0, 0)),    # b2 (resident)
                ],
                out_specs=pl.BlockSpec((TM, d_model), lambda i: (i, 0)),
            ),
            compiler_params=compiler_params,
            cost_estimate=cost,
        )(x2d, w1, b1_2d, w2, b2_2d)
    else:
        compiler_params = pltpu.CompilerParams(
            dimension_semantics=("parallel", "arbitrary"),
            vmem_limit_bytes=prof["vmem"])
        out = pl.pallas_call(
            _ffn_kernel_reduce,
            out_shape=jax.ShapeDtypeStruct((Mp, d_model), x.dtype),
            grid_spec=pltpu.PrefetchScalarGridSpec(
                num_scalar_prefetch=0,
                grid=(m_tiles, Fp // TF),                            # d_ff axis last
                in_specs=[
                    pl.BlockSpec((TM, d_model), lambda i, k: (i, 0)),  # x tile
                    pl.BlockSpec((d_model, TF), lambda i, k: (0, k)),  # w1 chunk
                    pl.BlockSpec((1, TF), lambda i, k: (0, k)),        # b1 chunk
                    pl.BlockSpec((TF, d_model), lambda i, k: (k, 0)),  # w2 chunk
                    pl.BlockSpec((1, d_model), lambda i, k: (0, 0)),   # b2 (resident)
                ],
                out_specs=pl.BlockSpec((TM, d_model), lambda i, k: (i, 0)),
                scratch_shapes=[pltpu.VMEM((TM, d_model), jnp.float32)],
            ),
            compiler_params=compiler_params,
            cost_estimate=cost,
        )(x2d, w1, b1_2d, w2, b2_2d)

    return out[:M].reshape(batch, seq, d_model)


# ----------------------------------------------------------------------------
# Params init + reference
# ----------------------------------------------------------------------------
def init_params(key, d_model, d_ff, dtype=jnp.float32):
    """Deterministic init mirroring nn.Linear's uniform(-1/sqrt(fan_in), +)."""
    k1, k2, k3, k4 = jax.random.split(key, 4)
    bound1 = 1.0 / math.sqrt(d_model)
    bound2 = 1.0 / math.sqrt(d_ff)
    w1 = jax.random.uniform(k1, (d_model, d_ff), dtype, -bound1, bound1)
    b1 = jax.random.uniform(k2, (d_ff,), dtype, -bound1, bound1)
    w2 = jax.random.uniform(k3, (d_ff, d_model), dtype, -bound2, bound2)
    b2 = jax.random.uniform(k4, (d_model,), dtype, -bound2, bound2)
    return w1, b1, w2, b2


def _ref(x, w1, b1, w2, b2):
    return jnp.maximum(x @ w1 + b1, 0.0) @ w2 + b2


if __name__ == "__main__":
    key = jax.random.PRNGKey(0)

    # Check 1: small shapes, auto tiling (weight-resident path, single M tile).
    batch, seq, d_model, d_ff = 2, 8, 32, 64
    kx, kp, key = jax.random.split(key, 3)
    x = jax.random.normal(kx, (batch, seq, d_model), jnp.float32)
    w1, b1, w2, b2 = init_params(kp, d_model, d_ff)
    y = feed_forward(x, w1, b1, w2, b2)
    jax.block_until_ready(y)
    assert y.shape == (batch, seq, d_model)
    assert jnp.allclose(y, _ref(x, w1, b1, w2, b2), atol=1e-4, rtol=1e-4)

    # Check 2: forced chunked path (M padding, multi-tile M, d_ff reduction across
    # multiple k-steps with the f32 accumulator).
    batch, seq, d_model, d_ff = 2, 9, 32, 256
    kx, kp, key = jax.random.split(key, 3)
    x = jax.random.normal(kx, (batch, seq, d_model), jnp.float32)
    w1, b1, w2, b2 = init_params(kp, d_model, d_ff)
    y = feed_forward(x, w1, b1, w2, b2, tm=8, tf=128)
    jax.block_until_ready(y)
    assert y.shape == (batch, seq, d_model)
    assert jnp.allclose(y, _ref(x, w1, b1, w2, b2), atol=1e-4, rtol=1e-4)

    # Check 3: bf16 operands (MXU-friendly contract), auto tiling.
    batch, seq, d_model, d_ff = 2, 64, 128, 512
    kx, kp = jax.random.split(key)
    x = jax.random.normal(kx, (batch, seq, d_model), jnp.float32).astype(jnp.bfloat16)
    w1, b1, w2, b2 = init_params(kp, d_model, d_ff, dtype=jnp.bfloat16)
    y = feed_forward(x, w1, b1, w2, b2)
    jax.block_until_ready(y)
    ref = _ref(x.astype(jnp.float32), w1.astype(jnp.float32), b1.astype(jnp.float32),
               w2.astype(jnp.float32), b2.astype(jnp.float32))
    assert y.shape == (batch, seq, d_model)
    assert jnp.allclose(y.astype(jnp.float32), ref, atol=5e-2, rtol=5e-2)

    print("KERNEL_OK")
</pallas_src>

<mosaic_0001>
module attributes {stable_mosaic.version = 11 : i64} {
  func.func @_ffn_kernel_resident(%arg0: i32, %arg1: memref<16x32xf32, #tpu.memory_space<vmem>>, %arg2: memref<32x64xf32, #tpu.memory_space<vmem>>, %arg3: memref<1x64xf32, #tpu.memory_space<vmem>>, %arg4: memref<64x32xf32, #tpu.memory_space<vmem>>, %arg5: memref<1x32xf32, #tpu.memory_space<vmem>>, %arg6: memref<16x32xf32, #tpu.memory_space<vmem>>) attributes {dimension_semantics = [#tpu.dimension_semantics<parallel>], iteration_bounds = array<i64: 1>, scalar_prefetch = 0 : i64, scratch_operands = 0 : i64, tpu.core_type = #tpu.core_type<tc>, window_params = [{transform_indices = @transform_0, window_bounds = array<i64: 16, 32>}, {pipeline_mode = #tpu.pipeline_mode<synchronous>, transform_indices = @transform_1, window_bounds = array<i64: 32, 64>}, {pipeline_mode = #tpu.pipeline_mode<synchronous>, transform_indices = @transform_2, window_bounds = array<i64: 1, 64>}, {pipeline_mode = #tpu.pipeline_mode<synchronous>, transform_indices = @transform_3, window_bounds = array<i64: 64, 32>}, {pipeline_mode = #tpu.pipeline_mode<synchronous>, transform_indices = @transform_4, window_bounds = array<i64: 1, 32>}, {transform_indices = @transform_5, window_bounds = array<i64: 16, 32>}]} {
    %c0 = arith.constant 0 : index
    %c0_0 = arith.constant 0 : index
    %0 = vector.load %arg1[%c0, %c0_0] : memref<16x32xf32, #tpu.memory_space<vmem>>, vector<16x32xf32>
    %c0_1 = arith.constant 0 : index
    %c0_2 = arith.constant 0 : index
    %1 = vector.load %arg2[%c0_1, %c0_2] : memref<32x64xf32, #tpu.memory_space<vmem>>, vector<32x64xf32>
    %cst = arith.constant dense<0.000000e+00> : vector<16x64xf32>
    %2 = tpu.matmul %0, %1, %cst {dimension_numbers = #tpu.dot_dimension_numbers<[1], [0], [0], [1], [0, 0, 1, 1], [], []>} : vector<16x32xf32>, vector<32x64xf32>, vector<16x64xf32> -> vector<16x64xf32>
    %c0_3 = arith.constant 0 : index
    %c0_4 = arith.constant 0 : index
    %3 = vector.load %arg3[%c0_3, %c0_4] : memref<1x64xf32, #tpu.memory_space<vmem>>, vector<1x64xf32>
    %4 = vector.broadcast %3 : vector<1x64xf32> to vector<16x64xf32>
    %5 = arith.addf %2, %4 : vector<16x64xf32>
    %cst_5 = arith.constant 0.000000e+00 : f32
    %6 = vector.broadcast %cst_5 : f32 to vector<16x64xf32>
    %7 = arith.maximumf %5, %6 : vector<16x64xf32>
    %c0_6 = arith.constant 0 : index
    %c0_7 = arith.constant 0 : index
    %8 = vector.load %arg4[%c0_6, %c0_7] : memref<64x32xf32, #tpu.memory_space<vmem>>, vector<64x32xf32>
    %cst_8 = arith.constant dense<0.000000e+00> : vector<16x32xf32>
    %9 = tpu.matmul %7, %8, %cst_8 {dimension_numbers = #tpu.dot_dimension_numbers<[1], [0], [0], [1], [0, 0, 1, 1], [], []>} : vector<16x64xf32>, vector<64x32xf32>, vector<16x32xf32> -> vector<16x32xf32>
    %c0_9 = arith.constant 0 : index
    %c0_10 = arith.constant 0 : index
    %10 = vector.load %arg5[%c0_9, %c0_10] : memref<1x32xf32, #tpu.memory_space<vmem>>, vector<1x32xf32>
    %11 = vector.broadcast %10 : vector<1x32xf32> to vector<16x32xf32>
    %12 = arith.addf %9, %11 : vector<16x32xf32>
    %c0_11 = arith.constant 0 : index
    %c0_12 = arith.constant 0 : index
    %13 = vector.load %arg6[%c0_11, %c0_12] : memref<16x32xf32, #tpu.memory_space<vmem>>, vector<16x32xf32>
    tpu.vector_store %arg6[%c0_11, %c0_12], %12 {strides = array<i32>} : memref<16x32xf32, #tpu.memory_space<vmem>>, vector<16x32xf32>,
    return
  }
  func.func @transform_0(%arg0: i32) -> (i32, i32) {
    %c0_i32 = arith.constant 0 : i32
    %c0_i32_0 = arith.constant 0 : i32
    return %arg0, %c0_i32 : i32, i32
  }
  func.func @transform_1(%arg0: i32) -> (i32, i32) {
    %c0_i32 = arith.constant 0 : i32
    %c0_i32_0 = arith.constant 0 : i32
    %c0_i32_1 = arith.constant 0 : i32
    return %c0_i32, %c0_i32_0 : i32, i32
  }
  func.func @transform_2(%arg0: i32) -> (i32, i32) {
    %c0_i32 = arith.constant 0 : i32
    %c0_i32_0 = arith.constant 0 : i32
    %c0_i32_1 = arith.constant 0 : i32
    return %c0_i32, %c0_i32_0 : i32, i32
  }
  func.func @transform_3(%arg0: i32) -> (i32, i32) {
    %c0_i32 = arith.constant 0 : i32
    %c0_i32_0 = arith.constant 0 : i32
    %c0_i32_1 = arith.constant 0 : i32
    return %c0_i32, %c0_i32_0 : i32, i32
  }
  func.func @transform_4(%arg0: i32) -> (i32, i32) {
    %c0_i32 = arith.constant 0 : i32
    %c0_i32_0 = arith.constant 0 : i32
    %c0_i32_1 = arith.constant 0 : i32
    return %c0_i32, %c0_i32_0 : i32, i32
  }
  func.func @transform_5(%arg0: i32) -> (i32, i32) {
    %c0_i32 = arith.constant 0 : i32
    %c0_i32_0 = arith.constant 0 : i32
    return %arg0, %c0_i32 : i32, i32
  }
}

</mosaic_0001>

<bundles_post_ra>
// kernel: tpu_custom_call.1
= control target key start
LH: loop header
LB: loop body
LE: loop exit
PB: predicated region body
PF: predicated region fallthrough
CT: control target
= control target key end

     0   :  { %s260_s0 = inlined_call_operand.vmem [shape: f32[16,32], index: 0, kind: input, shape index: {}]   ;;  %s261_s1 = inlined_call_operand.vmem [shape: f32[32,64], index: 1, kind: input, shape index: {}]   ;;  %s262_s2 = inlined_call_operand.vmem [shape: f32[1,64], index: 2, kind: input, shape index: {}]   ;;  %s263_s3 = inlined_call_operand.vmem [shape: f32[64,32], index: 3, kind: input, shape index: {}]   ;;  %s264_s4 = inlined_call_operand.vmem [shape: f32[1,32], index: 4, kind: input, shape index: {}]   ;;  %s265_s5 = inlined_call_operand.hbm [shape: f32[16,32], index: 5, kind: output, shape index: {}]  }
   0x1   :  { %v26_v0 = vld [vmem:[%s261_s1 + $0x18] sm:$0xff]  ;;  %v25_v1 = vld [vmem:[%s261_s1 + $0x10] sm:$0xff]  ;;  %v24_v2 = vld [vmem:[%s261_s1 + $0x8] sm:$0xff] }
   0x2   :  { %129 = vmatpush.msra.mxu3 %v26_v0  ;;  %50 = vmatpush.msra.mxu0 %v26_v0  ;;  %v70_v3 = vld [vmem:[%s263_s3 + $0x38] sm:$0xff]  ;;  %v69_v4 = vld [vmem:[%s263_s3 + $0x30] sm:$0xff]  ;;  %v23_v5 = vld [vmem:[%s261_s1] sm:$0xff] }
   0x3   :  { %133 = vmatpush.msra.mxu2 %v70_v3  ;;  %90 = vmatpush.msra.mxu1 %v70_v3 }
   0x4   :  { %130 = vmatpush.msra.mxu3 %v25_v1  ;;  %51 = vmatpush.msra.mxu0 %v25_v1 }
   0x5   :  { %10 = vsyncpa [#allocation3], 0  ;;  %v22_v6 = vld [vmem:[%s260_s0 + $0x8] sm:$0xff]  ;;  %vm31_vm0 = vcmask 261120   ;;  %v21_v7 = vld [vmem:[%s260_s0] sm:$0xff]  ;;  %134 = vmatpush.msra.mxu2 %v69_v4  ;;  %91 = vmatpush.msra.mxu1 %v69_v4  ;;  %vm75_vm1 = vcmask 523264  }
   0x6   :  { %131 = vmatpush.msra.mxu3 %v24_v2  ;;  %52 = vmatpush.msra.mxu0 %v24_v2  ;;  %v68_v8 = vld [vmem:[%s263_s3 + $0x28] sm:$0xff]  ;;  %v67_v9 = vld [vmem:[%s263_s3 + $0x20] sm:$0xff]  ;;  %v66_v10 = vld [vmem:[%s263_s3 + $0x18] sm:$0xff]  ;;  %s113_s25 = sshll.u32 %s265_s5, 4  ;;  %s173_s26 = smov 128   ;;  %s114_s25 = int_to_ptr.hbm [resolvable:$true] %s113_s25 }
   0x7   :  { %135 = vmatpush.msra.mxu2 %v68_v8  ;;  %92 = vmatpush.msra.mxu1 %v68_v8  ;;  %v65_v11 = vld [vmem:[%s263_s3 + $0x10] sm:$0xff]  ;;  %v64_v12 = vld [vmem:[%s263_s3 + $0x8] sm:$0xff]  ;;  %v63_v13 = vld [vmem:[%s263_s3] sm:$0xff]  ;;  %s172_s3 = smov [#allocation2]   ;;  %s174_s27 = smov 8  }
   0x8   :  { %132 = vmatpush.msra.mxu3 %v23_v5  ;;  %53 = vmatpush.msra.mxu0 %v23_v5  ;;  %v144_v14 = vld [vmem:[%s262_s2] ss:$0 sm:$0xff]  ;;  %s111_s23 = sshll.u32 %s172_s3, 4  ;;  %s112_s23 = int_to_ptr.vmem [resolvable:$true] %s111_s23 }
   0x9   :  { %126 = vmatmul.msk.f32.vlgmr.msra.gmra.mxu3 %vm31_vm0, %v22_v6  ;;  %125 = vmatmul.msk.f32.vlgmr.msra.gmra.mxu0 %vm31_vm0, %v21_v7  ;;  %v145_v21 = vld [vmem:[%s264_s4] ss:$0 sm:$0xff] }
   0xa   :  { %136 = vmatpush.msra.mxu2 %v67_v9  ;;  %93 = vmatpush.msra.mxu1 %v67_v9 }
   0xc   :  { %137 = vmatpush.msra.mxu2 %v66_v10  ;;  %94 = vmatpush.msra.mxu1 %v66_v10 }
   0xe   :  { %138 = vmatpush.msra.mxu2 %v65_v11  ;;  %95 = vmatpush.msra.mxu1 %v65_v11 }
  0x10   :  { %139 = vmatpush.msra.mxu2 %v64_v12  ;;  %96 = vmatpush.msra.mxu1 %v64_v12 }
  0x12   :  { %140 = vmatpush.msra.mxu2 %v63_v13  ;;  %97 = vmatpush.msra.mxu1 %v63_v13 }
  0x86   :  { %v55_v15 = vpop.f32.mrf.mxu0 }
  0x87   :  { %v56_v16 = vadd.f32 %v144_v14, %v55_v15 }
  0x89   :  { %v61_v17 = vmax.f32 %v56_v16, 0.0 }
  0x8b   :  { %127 = vmatmul.msk.f32.vlgmr.msra.gmra.mxu1 %vm75_vm1, %v61_v17 }
  0x8c   :  { %v58_v18 = vpop.f32.mrf.mxu3 }
  0x8d   :  { %v59_v19 = vadd.f32 %v144_v14, %v58_v18 }
  0x8f   :  { %v62_v20 = vmax.f32 %v59_v19, 0.0 }
  0x91   :  { %128 = vmatmul.msk.f32.vlgmr.msra.gmra.mxu2 %vm75_vm1, %v62_v20 }
 0x108   :  { %v99_v22 = vpop.f32.mrf.mxu1 }
 0x109   :  { %v100_v23 = vadd.f32 %v145_v21, %v99_v22 }
 0x10b   :  { %105 = vst.msk [vmem:[#allocation2] sm:$0xff] %vm31_vm0, %v100_v23 }
 0x114   :  { %v102_v24 = vpop.f32.mrf.mxu2 }
 0x115   :  { %v103_v25 = vadd.f32 %v145_v21, %v102_v24 }
 0x117   :  { %106 = vst.msk [vmem:[#allocation2 + $0x8] sm:$0xff] %vm31_vm0, %v103_v25 }
 0x118   :  { %119 = dma.vmem_to_hbm [thread:$0]  %s112_s23, 256, %s114_s25, [#allocation3], %s173_s26, %s173_s26, %s174_s27  }
 0x119   :  { %170 = dma.done.wait [#allocation3], 256  }
 0x11a   :  { %171 = vsyncadd [#allocation3], 4294967040 }
 0x11b   :  { %124 = vsyncpa [#allocation3], 1 }

</bundles_post_ra>
